<compile_context>
chip_gen: v7x
topology: tpu7x:2x2x1
jax: 0.10.0
libtpu: 0.0.40
codegen_flags: <defaults>
</compile_context>

<pallas_src>
import functools

import jax
import jax.numpy as jnp
from jax.experimental import pallas as pl
from jax.experimental.pallas import tpu as pltpu


def _round_up(x, m):
    return (x + m - 1) // m * m


# ----------------------------------------------------------------------------
# Single fused kernel:
#   psp:   syn = syn - syn/tau_s + x[t] ; psp[t] = syn/tau_s
#   layer: y_all = psp_all @ W^T          (one bf16 MXU matmul, f32 accum)
#          mem   = mem*(1 - 1/tau_m) + y[t]
#          fired = mem > threshold ;  mem = where(fired, 0, mem)
#          syn   = syn + (fired - syn)/tau_s ;  out[t] = syn
#   head:  out = out * scale + bias        (XOR dataset only)
# ----------------------------------------------------------------------------
def _fused_snn_kernel(sb_ref, x_ref, *w_out_scratch, n_layers, n_steps, n_rows,
                      feat_dims, thresholds, theta_m, theta_s, inv_tau_s,
                      apply_affine):
    w_refs = w_out_scratch[:n_layers]          # bf16 [Fprev_p, Fout_p]
    o_ref = w_out_scratch[n_layers]            # f32  [T*Np, Flast_p]
    act_ref = w_out_scratch[n_layers + 1]      # f32  [T*Np, Fmax_p] scratch

    T, N = n_steps, n_rows
    f_in = feat_dims[0]

    # ---- psp temporal filter: per-step write into the scratch slab ----
    syn = jnp.zeros((N, f_in), jnp.float32)
    for t in range(T):
        syn = syn - syn * inv_tau_s + x_ref[pl.ds(t * N, N), :]
        act_ref[pl.ds(t * N, N), pl.ds(0, f_in)] = syn * inv_tau_s

    # ---- stacked LIF fully-connected layers (rule='BP', model='LIF') ----
    for li in range(n_layers):
        f_prev = feat_dims[li]
        f_out = feat_dims[li + 1]
        thr = thresholds[li]
        last = li == n_layers - 1

        # One MXU matmul over all T*N rows, hoisted out of the recurrence.
        # Contiguous [T*N, K] operand straight from VMEM scratch -> no
        # relayout; bf16 operands, f32 accumulation.
        lhs = act_ref[:, pl.ds(0, f_prev)].astype(jnp.bfloat16)
        y = jnp.dot(lhs, w_refs[li][...], preferred_element_type=jnp.float32)

        mem = jnp.zeros((N, f_out), jnp.float32)
        synp = jnp.zeros((N, f_out), jnp.float32)
        for t in range(T):
            mem = mem * (1.0 - theta_m) + y[t * N:(t + 1) * N, :]
            fired = mem > thr
            mem = jnp.where(fired, 0.0, mem)             # fused LIF reset
            synp = synp + (fired.astype(jnp.float32) - synp) * theta_s
            if last:
                out_t = synp * sb_ref[0] + sb_ref[1] if apply_affine else synp
                o_ref[pl.ds(t * N, N), :] = out_t        # lane-dense store
            else:
                act_ref[pl.ds(t * N, N), pl.ds(0, f_out)] = synp

    # TODO(synk): the PyTorch forward also print()s scale/bias each call;
    # debug-only side effect, omitted.


# ----------------------------------------------------------------------------
# Network forward (host-side glue: flatten / pad / transpose only)
# ----------------------------------------------------------------------------
def network_forward(spike_input, weights, thresholds, scale_bias, cfg):
    N, C, H, W, T = spike_input.shape
    F_in = C * H * W
    layer_out = [w.shape[0] for w in weights]
    F_out = layer_out[-1]

    # Pad batch to sublanes (8) and every feature dim to lanes (128).
    Np = _round_up(N, 8)
    feat = [F_in] + layer_out
    feat_p = [_round_up(f, 128) for f in feat]
    F_scr = max(feat_p[:-1])                       # scratch holds psp + hidden

    # Time-major, feature-flattened, padded: [T*Np, Fin_p].
    x = spike_input.reshape(N, F_in, T).astype(jnp.float32)
    x = jnp.transpose(x, (2, 0, 1))                # [T, N, F_in]
    x = jnp.pad(x, ((0, 0), (0, Np - N), (0, feat_p[0] - F_in)))
    x = x.reshape(T * Np, feat_p[0])

    # Pre-transpose + zero-pad weights once on host -> bf16 [Fprev_p, Fout_p].
    w_pad = []
    for li, w in enumerate(weights):
        wt = jnp.asarray(w, jnp.float32).T
        wt = jnp.pad(wt, ((0, feat_p[li] - wt.shape[0]),
                          (0, feat_p[li + 1] - wt.shape[1])))
        w_pad.append(wt.astype(jnp.bfloat16))

    theta_m = 1.0 / cfg["tau_m"]
    theta_s = 1.0 / cfg["tau_s"]
    inv_tau_s = 1.0 / cfg["tau_s"]
    apply_affine = (cfg["dataset"] == "XOR")

    kernel = functools.partial(
        _fused_snn_kernel,
        n_layers=len(weights),
        n_steps=T,
        n_rows=Np,
        feat_dims=tuple(feat_p),
        thresholds=tuple(float(t) for t in thresholds),
        theta_m=theta_m,
        theta_s=theta_s,
        inv_tau_s=inv_tau_s,
        apply_affine=apply_affine,
    )

    # Explicit VMEM budget (resident inputs + output + scratch slab + weights).
    resident = (x.size + T * Np * feat_p[-1] + T * Np * F_scr) * 4 \
               + sum(int(w.size) for w in w_pad) * 2
    vmem_limit = int(min(100 * 1024 * 1024, max(4 * 1024 * 1024, 2 * resident)))

    out = pl.pallas_call(
        kernel,
        out_shape=jax.ShapeDtypeStruct((T * Np, feat_p[-1]), jnp.float32),
        in_specs=[pl.BlockSpec(memory_space=pltpu.MemorySpace.SMEM)]      # scale/bias
                 + [pl.BlockSpec(memory_space=pltpu.MemorySpace.VMEM)]    # x
                 + [pl.BlockSpec(memory_space=pltpu.MemorySpace.VMEM)] * len(weights),
        out_specs=pl.BlockSpec(memory_space=pltpu.MemorySpace.VMEM),
        scratch_shapes=[pltpu.VMEM((T * Np, F_scr), jnp.float32)],
        compiler_params=pltpu.CompilerParams(vmem_limit_bytes=vmem_limit),
    )(jnp.asarray(scale_bias, jnp.float32), x, *w_pad)

    # Unpad + restore PyTorch layout [N, F_out, 1, 1, T] (negligible at this size).
    out = out.reshape(T, Np, feat_p[-1])[:, :N, :F_out]
    return jnp.transpose(out, (1, 2, 0)).reshape(N, F_out, 1, 1, T)


# ----------------------------------------------------------------------------
# Pure-JAX reference (same math; mirrors the kernel's bf16-operand / f32-accum
# MXU precision so the spike comparisons are apples-to-apples).
# ----------------------------------------------------------------------------
def reference_forward(spike_input, weights, thresholds, scale_bias, cfg):
    N, C, H, W, T = spike_input.shape
    theta_s = 1.0 / cfg["tau_s"]
    theta_m = 1.0 / cfg["tau_m"]
    inv_tau_s = 1.0 / cfg["tau_s"]

    x = spike_input.reshape(N, C * H * W, T).astype(jnp.float32)
    syn = jnp.zeros((N, C * H * W), jnp.float32)
    cur = []
    for t in range(T):
        syn = syn - syn * inv_tau_s + x[..., t]
        cur.append(syn * inv_tau_s)
    cur = jnp.stack(cur, axis=0)                   # [T, N, F]

    for w, thr in zip(weights, thresholds):
        F_o = w.shape[0]
        wt = jnp.asarray(w, jnp.float32).T.astype(jnp.bfloat16)
        mem = jnp.zeros((N, F_o), jnp.float32)
        synp = jnp.zeros((N, F_o), jnp.float32)
        outs = []
        for t in range(T):
            y = jnp.dot(cur[t].astype(jnp.bfloat16), wt,
                        preferred_element_type=jnp.float32)
            mem = mem * (1.0 - theta_m) + y
            fired = mem > thr
            mem = jnp.where(fired, 0.0, mem)
            synp = synp + (fired.astype(jnp.float32) - synp) * theta_s
            outs.append(synp)
        cur = jnp.stack(outs, axis=0)

    if cfg["dataset"] == "XOR":
        cur = cur * scale_bias[0] + scale_bias[1]
    return jnp.transpose(cur, (1, 2, 0)).reshape(N, weights[-1].shape[0], 1, 1, T)


if __name__ == "__main__":
    # Synthetic deterministic config (layers_config: two 'linear' layers
    # 4 -> 32 -> 4, network_config: LIF / BP / XOR dataset).
    cfg = {"model": "LIF", "rule": "BP", "dataset": "XOR",
           "n_steps": 8, "tau_s": 2.0, "tau_m": 5.0}
    N, C, H, W, T = 2, 4, 1, 1, cfg["n_steps"]
    F_in, HID, F_out = C * H * W, 32, 4

    key = jax.random.PRNGKey(0)
    k_in, k_w1, k_w2 = jax.random.split(key, 3)

    spike_input = jax.random.bernoulli(k_in, 0.3, (N, C, H, W, T)).astype(jnp.float32)
    w1 = jax.random.normal(k_w1, (HID, F_in), jnp.float32) * 0.8
    w2 = jax.random.normal(k_w2, (F_out, HID), jnp.float32) * 0.4
    weights = [w1, w2]
    thresholds = [0.2, 0.2]
    scale_bias = jnp.array([1.0, 0.0], jnp.float32)   # nn.Parameter scale / bias init

    out = network_forward(spike_input, weights, thresholds, scale_bias, cfg)
    out = jax.block_until_ready(out)

    ref = reference_forward(spike_input, weights, thresholds, scale_bias, cfg)
    assert out.shape == (N, F_out, 1, 1, T), out.shape
    assert jnp.allclose(out, ref, rtol=1e-5, atol=1e-5), "mismatch vs reference"

    print("KERNEL_OK")
</pallas_src>

<mosaic_0001>
module attributes {stable_mosaic.version = 11 : i64} {
  func.func @_fused_snn_kernel(%arg0: memref<2xf32, #tpu.memory_space<smem>>, %arg1: memref<64x128xf32, #tpu.memory_space<vmem>>, %arg2: memref<128x128xbf16, #tpu.memory_space<vmem>>, %arg3: memref<128x128xbf16, #tpu.memory_space<vmem>>, %arg4: memref<64x128xf32, #tpu.memory_space<vmem>>, %arg5: memref<64x128xf32, #tpu.memory_space<vmem>>) attributes {dimension_semantics = [], scalar_prefetch = 0 : i64, scratch_operands = 1 : i64, tpu.core_type = #tpu.core_type<tc>} {
    %cst = arith.constant 0.000000e+00 : f32
    %0 = vector.broadcast %cst : f32 to vector<8x128xf32>
    %cst_0 = arith.constant 5.000000e-01 : f32
    %1 = vector.broadcast %cst_0 : f32 to vector<8x128xf32>
    %2 = arith.mulf %0, %1 : vector<8x128xf32>
    %3 = arith.subf %0, %2 : vector<8x128xf32>
    %c0 = arith.constant 0 : index
    %c0_1 = arith.constant 0 : index
    %4 = vector.load %arg1[%c0, %c0_1] : memref<64x128xf32, #tpu.memory_space<vmem>>, vector<8x128xf32>
    %5 = arith.addf %3, %4 : vector<8x128xf32>
    %cst_2 = arith.constant 5.000000e-01 : f32
    %6 = vector.broadcast %cst_2 : f32 to vector<8x128xf32>
    %7 = arith.mulf %5, %6 : vector<8x128xf32>
    %c0_3 = arith.constant 0 : index
    %c0_4 = arith.constant 0 : index
    %8 = vector.load %arg5[%c0_3, %c0_4] : memref<64x128xf32, #tpu.memory_space<vmem>>, vector<8x128xf32>
    tpu.vector_store %arg5[%c0_3, %c0_4], %7 {strides = array<i32>} : memref<64x128xf32, #tpu.memory_space<vmem>>, vector<8x128xf32>,
    %cst_5 = arith.constant 5.000000e-01 : f32
    %9 = vector.broadcast %cst_5 : f32 to vector<8x128xf32>
    %10 = arith.mulf %5, %9 : vector<8x128xf32>
    %11 = arith.subf %5, %10 : vector<8x128xf32>
    %c8 = arith.constant 8 : index
    %c0_6 = arith.constant 0 : index
    %12 = vector.load %arg1[%c8, %c0_6] : memref<64x128xf32, #tpu.memory_space<vmem>>, vector<8x128xf32>
    %13 = arith.addf %11, %12 : vector<8x128xf32>
    %cst_7 = arith.constant 5.000000e-01 : f32
    %14 = vector.broadcast %cst_7 : f32 to vector<8x128xf32>
    %15 = arith.mulf %13, %14 : vector<8x128xf32>
    %c8_8 = arith.constant 8 : index
    %c0_9 = arith.constant 0 : index
    %16 = vector.load %arg5[%c8_8, %c0_9] : memref<64x128xf32, #tpu.memory_space<vmem>>, vector<8x128xf32>
    tpu.vector_store %arg5[%c8_8, %c0_9], %15 {strides = array<i32>} : memref<64x128xf32, #tpu.memory_space<vmem>>, vector<8x128xf32>,
    %cst_10 = arith.constant 5.000000e-01 : f32
    %17 = vector.broadcast %cst_10 : f32 to vector<8x128xf32>
    %18 = arith.mulf %13, %17 : vector<8x128xf32>
    %19 = arith.subf %13, %18 : vector<8x128xf32>
    %c16 = arith.constant 16 : index
    %c0_11 = arith.constant 0 : index
    %20 = vector.load %arg1[%c16, %c0_11] : memref<64x128xf32, #tpu.memory_space<vmem>>, vector<8x128xf32>
    %21 = arith.addf %19, %20 : vector<8x128xf32>
    %cst_12 = arith.constant 5.000000e-01 : f32
    %22 = vector.broadcast %cst_12 : f32 to vector<8x128xf32>
    %23 = arith.mulf %21, %22 : vector<8x128xf32>
    %c16_13 = arith.constant 16 : index
    %c0_14 = arith.constant 0 : index
    %24 = vector.load %arg5[%c16_13, %c0_14] : memref<64x128xf32, #tpu.memory_space<vmem>>, vector<8x128xf32>
    tpu.vector_store %arg5[%c16_13, %c0_14], %23 {strides = array<i32>} : memref<64x128xf32, #tpu.memory_space<vmem>>, vector<8x128xf32>,
    %cst_15 = arith.constant 5.000000e-01 : f32
    %25 = vector.broadcast %cst_15 : f32 to vector<8x128xf32>
    %26 = arith.mulf %21, %25 : vector<8x128xf32>
    %27 = arith.subf %21, %26 : vector<8x128xf32>
    %c24 = arith.constant 24 : index
    %c0_16 = arith.constant 0 : index
    %28 = vector.load %arg1[%c24, %c0_16] : memref<64x128xf32, #tpu.memory_space<vmem>>, vector<8x128xf32>
    %29 = arith.addf %27, %28 : vector<8x128xf32>
    %cst_17 = arith.constant 5.000000e-01 : f32
    %30 = vector.broadcast %cst_17 : f32 to vector<8x128xf32>
    %31 = arith.mulf %29, %30 : vector<8x128xf32>
    %c24_18 = arith.constant 24 : index
    %c0_19 = arith.constant 0 : index
    %32 = vector.load %arg5[%c24_18, %c0_19] : memref<64x128xf32, #tpu.memory_space<vmem>>, vector<8x128xf32>
    tpu.vector_store %arg5[%c24_18, %c0_19], %31 {strides = array<i32>} : memref<64x128xf32, #tpu.memory_space<vmem>>, vector<8x128xf32>,
    %cst_20 = arith.constant 5.000000e-01 : f32
    %33 = vector.broadcast %cst_20 : f32 to vector<8x128xf32>
    %34 = arith.mulf %29, %33 : vector<8x128xf32>
    %35 = arith.subf %29, %34 : vector<8x128xf32>
    %c32 = arith.constant 32 : index
    %c0_21 = arith.constant 0 : index
    %36 = vector.load %arg1[%c32, %c0_21] : memref<64x128xf32, #tpu.memory_space<vmem>>, vector<8x128xf32>
    %37 = arith.addf %35, %36 : vector<8x128xf32>
    %cst_22 = arith.constant 5.000000e-01 : f32
    %38 = vector.broadcast %cst_22 : f32 to vector<8x128xf32>
    %39 = arith.mulf %37, %38 : vector<8x128xf32>
    %c32_23 = arith.constant 32 : index
    %c0_24 = arith.constant 0 : index
    %40 = vector.load %arg5[%c32_23, %c0_24] : memref<64x128xf32, #tpu.memory_space<vmem>>, vector<8x128xf32>
    tpu.vector_store %arg5[%c32_23, %c0_24], %39 {strides = array<i32>} : memref<64x128xf32, #tpu.memory_space<vmem>>, vector<8x128xf32>,
    %cst_25 = arith.constant 5.000000e-01 : f32
    %41 = vector.broadcast %cst_25 : f32 to vector<8x128xf32>
    %42 = arith.mulf %37, %41 : vector<8x128xf32>
    %43 = arith.subf %37, %42 : vector<8x128xf32>
    %c40 = arith.constant 40 : index
    %c0_26 = arith.constant 0 : index
    %44 = vector.load %arg1[%c40, %c0_26] : memref<64x128xf32, #tpu.memory_space<vmem>>, vector<8x128xf32>
    %45 = arith.addf %43, %44 : vector<8x128xf32>
    %cst_27 = arith.constant 5.000000e-01 : f32
    %46 = vector.broadcast %cst_27 : f32 to vector<8x128xf32>
    %47 = arith.mulf %45, %46 : vector<8x128xf32>
    %c40_28 = arith.constant 40 : index
    %c0_29 = arith.constant 0 : index
    %48 = vector.load %arg5[%c40_28, %c0_29] : memref<64x128xf32, #tpu.memory_space<vmem>>, vector<8x128xf32>
    tpu.vector_store %arg5[%c40_28, %c0_29], %47 {strides = array<i32>} : memref<64x128xf32, #tpu.memory_space<vmem>>, vector<8x128xf32>,
    %cst_30 = arith.constant 5.000000e-01 : f32
    %49 = vector.broadcast %cst_30 : f32 to vector<8x128xf32>
    %50 = arith.mulf %45, %49 : vector<8x128xf32>
    %51 = arith.subf %45, %50 : vector<8x128xf32>
    %c48 = arith.constant 48 : index
    %c0_31 = arith.constant 0 : index
    %52 = vector.load %arg1[%c48, %c0_31] : memref<64x128xf32, #tpu.memory_space<vmem>>, vector<8x128xf32>
    %53 = arith.addf %51, %52 : vector<8x128xf32>
    %cst_32 = arith.constant 5.000000e-01 : f32
    %54 = vector.broadcast %cst_32 : f32 to vector<8x128xf32>
    %55 = arith.mulf %53, %54 : vector<8x128xf32>
    %c48_33 = arith.constant 48 : index
    %c0_34 = arith.constant 0 : index
    %56 = vector.load %arg5[%c48_33, %c0_34] : memref<64x128xf32, #tpu.memory_space<vmem>>, vector<8x128xf32>
    tpu.vector_store %arg5[%c48_33, %c0_34], %55 {strides = array<i32>} : memref<64x128xf32, #tpu.memory_space<vmem>>, vector<8x128xf32>,
    %cst_35 = arith.constant 5.000000e-01 : f32
    %57 = vector.broadcast %cst_35 : f32 to vector<8x128xf32>
    %58 = arith.mulf %53, %57 : vector<8x128xf32>
    %59 = arith.subf %53, %58 : vector<8x128xf32>
    %c56 = arith.constant 56 : index
    %c0_36 = arith.constant 0 : index
    %60 = vector.load %arg1[%c56, %c0_36] : memref<64x128xf32, #tpu.memory_space<vmem>>, vector<8x128xf32>
    %61 = arith.addf %59, %60 : vector<8x128xf32>
    %cst_37 = arith.constant 5.000000e-01 : f32
    %62 = vector.broadcast %cst_37 : f32 to vector<8x128xf32>
    %63 = arith.mulf %61, %62 : vector<8x128xf32>
    %c56_38 = arith.constant 56 : index
    %c0_39 = arith.constant 0 : index
    %64 = vector.load %arg5[%c56_38, %c0_39] : memref<64x128xf32, #tpu.memory_space<vmem>>, vector<8x128xf32>
    tpu.vector_store %arg5[%c56_38, %c0_39], %63 {strides = array<i32>} : memref<64x128xf32, #tpu.memory_space<vmem>>, vector<8x128xf32>,
    %c0_40 = arith.constant 0 : index
    %c0_41 = arith.constant 0 : index
    %65 = vector.load %arg5[%c0_40, %c0_41] : memref<64x128xf32, #tpu.memory_space<vmem>>, vector<64x128xf32>
    %66 = arith.truncf %65 : vector<64x128xf32> to vector<64x128xbf16>
    %c0_42 = arith.constant 0 : index
    %c0_43 = arith.constant 0 : index
    %67 = vector.load %arg2[%c0_42, %c0_43] : memref<128x128xbf16, #tpu.memory_space<vmem>>, vector<128x128xbf16>
    %cst_44 = arith.constant dense<0.000000e+00> : vector<64x128xf32>
    %68 = tpu.matmul %66, %67, %cst_44 {dimension_numbers = #tpu.dot_dimension_numbers<[1], [0], [0], [1], [0, 0, 1, 1], [], []>} : vector<64x128xbf16>, vector<128x128xbf16>, vector<64x128xf32> -> vector<64x128xf32>
    %cst_45 = arith.constant 0.000000e+00 : f32
    %69 = vector.broadcast %cst_45 : f32 to vector<8x128xf32>
    %cst_46 = arith.constant 0.000000e+00 : f32
    %70 = vector.broadcast %cst_46 : f32 to vector<8x128xf32>
    %cst_47 = arith.constant 8.000000e-01 : f32
    %71 = vector.broadcast %cst_47 : f32 to vector<8x128xf32>
    %72 = arith.mulf %69, %71 : vector<8x128xf32>
    %73 = vector.extract_strided_slice %68 {offsets = [0, 0], sizes = [8, 128], strides = [1, 1]} : vector<64x128xf32> to vector<8x128xf32>
    %74 = arith.addf %72, %73 : vector<8x128xf32>
    %cst_48 = arith.constant 2.000000e-01 : f32
    %75 = vector.broadcast %cst_48 : f32 to vector<8x128xf32>
    %76 = arith.cmpf ogt, %74, %75 : vector<8x128xf32>
    %cst_49 = arith.constant 0.000000e+00 : f32
    %77 = vector.broadcast %cst_49 : f32 to vector<8x128xf32>
    %78 = arith.select %76, %77, %74 : vector<8x128xi1>, vector<8x128xf32>
    %79 = arith.extui %76 : vector<8x128xi1> to vector<8x128xi32>
    %80 = arith.sitofp %79 : vector<8x128xi32> to vector<8x128xf32>
    %81 = arith.subf %80, %70 : vector<8x128xf32>
    %cst_50 = arith.constant 5.000000e-01 : f32
    %82 = vector.broadcast %cst_50 : f32 to vector<8x128xf32>
    %83 = arith.mulf %81, %82 : vector<8x128xf32>
    %84 = arith.addf %70, %83 : vector<8x128xf32>
    %c0_51 = arith.constant 0 : index
    %c0_52 = arith.constant 0 : index
    %85 = vector.load %arg5[%c0_51, %c0_52] : memref<64x128xf32, #tpu.memory_space<vmem>>, vector<8x128xf32>
    tpu.vector_store %arg5[%c0_51, %c0_52], %84 {strides = array<i32>} : memref<64x128xf32, #tpu.memory_space<vmem>>, vector<8x128xf32>,
    %cst_53 = arith.constant 8.000000e-01 : f32
    %86 = vector.broadcast %cst_53 : f32 to vector<8x128xf32>
    %87 = arith.mulf %78, %86 : vector<8x128xf32>
    %88 = vector.extract_strided_slice %68 {offsets = [8, 0], sizes = [8, 128], strides = [1, 1]} : vector<64x128xf32> to vector<8x128xf32>
    %89 = arith.addf %87, %88 : vector<8x128xf32>
    %cst_54 = arith.constant 2.000000e-01 : f32
    %90 = vector.broadcast %cst_54 : f32 to vector<8x128xf32>
    %91 = arith.cmpf ogt, %89, %90 : vector<8x128xf32>
    %cst_55 = arith.constant 0.000000e+00 : f32
    %92 = vector.broadcast %cst_55 : f32 to vector<8x128xf32>
    %93 = arith.select %91, %92, %89 : vector<8x128xi1>, vector<8x128xf32>
    %94 = arith.extui %91 : vector<8x128xi1> to vector<8x128xi32>
    %95 = arith.sitofp %94 : vector<8x128xi32> to vector<8x128xf32>
    %96 = arith.subf %95, %84 : vector<8x128xf32>
    %cst_56 = arith.constant 5.000000e-01 : f32
    %97 = vector.broadcast %cst_56 : f32 to vector<8x128xf32>
    %98 = arith.mulf %96, %97 : vector<8x128xf32>
    %99 = arith.addf %84, %98 : vector<8x128xf32>
    %c8_57 = arith.constant 8 : index
    %c0_58 = arith.constant 0 : index
    %100 = vector.load %arg5[%c8_57, %c0_58] : memref<64x128xf32, #tpu.memory_space<vmem>>, vector<8x128xf32>
    tpu.vector_store %arg5[%c8_57, %c0_58], %99 {strides = array<i32>} : memref<64x128xf32, #tpu.memory_space<vmem>>, vector<8x128xf32>,
    %cst_59 = arith.constant 8.000000e-01 : f32
    %101 = vector.broadcast %cst_59 : f32 to vector<8x128xf32>
    %102 = arith.mulf %93, %101 : vector<8x128xf32>
    %103 = vector.extract_strided_slice %68 {offsets = [16, 0], sizes = [8, 128], strides = [1, 1]} : vector<64x128xf32> to vector<8x128xf32>
    %104 = arith.addf %102, %103 : vector<8x128xf32>
    %cst_60 = arith.constant 2.000000e-01 : f32
    %105 = vector.broadcast %cst_60 : f32 to vector<8x128xf32>
    %106 = arith.cmpf ogt, %104, %105 : vector<8x128xf32>
    %cst_61 = arith.constant 0.000000e+00 : f32
    %107 = vector.broadcast %cst_61 : f32 to vector<8x128xf32>
    %108 = arith.select %106, %107, %104 : vector<8x128xi1>, vector<8x128xf32>
    %109 = arith.extui %106 : vector<8x128xi1> to vector<8x128xi32>
    %110 = arith.sitofp %109 : vector<8x128xi32> to vector<8x128xf32>
    %111 = arith.subf %110, %99 : vector<8x128xf32>
    %cst_62 = arith.constant 5.000000e-01 : f32
    %112 = vector.broadcast %cst_62 : f32 to vector<8x128xf32>
    %113 = arith.mulf %111, %112 : vector<8x128xf32>
    %114 = arith.addf %99, %113 : vector<8x128xf32>
    %c16_63 = arith.constant 16 : index
    %c0_64 = arith.constant 0 : index
    %115 = vector.load %arg5[%c16_63, %c0_64] : memref<64x128xf32, #tpu.memory_space<vmem>>, vector<8x128xf32>
    tpu.vector_store %arg5[%c16_63, %c0_64], %114 {strides = array<i32>} : memref<64x128xf32, #tpu.memory_space<vmem>>, vector<8x128xf32>,
    %cst_65 = arith.constant 8.000000e-01 : f32
    %116 = vector.broadcast %cst_65 : f32 to vector<8x128xf32>
    %117 = arith.mulf %108, %116 : vector<8x128xf32>
    %118 = vector.extract_strided_slice %68 {offsets = [24, 0], sizes = [8, 128], strides = [1, 1]} : vector<64x128xf32> to vector<8x128xf32>
    %119 = arith.addf %117, %118 : vector<8x128xf32>
    %cst_66 = arith.constant 2.000000e-01 : f32
    %120 = vector.broadcast %cst_66 : f32 to vector<8x128xf32>
    %121 = arith.cmpf ogt, %119, %120 : vector<8x128xf32>
    %cst_67 = arith.constant 0.000000e+00 : f32
    %122 = vector.broadcast %cst_67 : f32 to vector<8x128xf32>
    %123 = arith.select %121, %122, %119 : vector<8x128xi1>, vector<8x128xf32>
    %124 = arith.extui %121 : vector<8x128xi1> to vector<8x128xi32>
    %125 = arith.sitofp %124 : vector<8x128xi32> to vector<8x128xf32>
    %126 = arith.subf %125, %114 : vector<8x128xf32>
    %cst_68 = arith.constant 5.000000e-01 : f32
    %127 = vector.broadcast %cst_68 : f32 to vector<8x128xf32>
    %128 = arith.mulf %126, %127 : vector<8x128xf32>
    %129 = arith.addf %114, %128 : vector<8x128xf32>
    %c24_69 = arith.constant 24 : index
    %c0_70 = arith.constant 0 : index
    %130 = vector.load %arg5[%c24_69, %c0_70] : memref<64x128xf32, #tpu.memory_space<vmem>>, vector<8x128xf32>
    tpu.vector_store %arg5[%c24_69, %c0_70], %129 {strides = array<i32>} : memref<64x128xf32, #tpu.memory_space<vmem>>, vector<8x128xf32>,
    %cst_71 = arith.constant 8.000000e-01 : f32
    %131 = vector.broadcast %cst_71 : f32 to vector<8x128xf32>
    %132 = arith.mulf %123, %131 : vector<8x128xf32>
    %133 = vector.extract_strided_slice %68 {offsets = [32, 0], sizes = [8, 128], strides = [1, 1]} : vector<64x128xf32> to vector<8x128xf32>
    %134 = arith.addf %132, %133 : vector<8x128xf32>
    %cst_72 = arith.constant 2.000000e-01 : f32
    %135 = vector.broadcast %cst_72 : f32 to vector<8x128xf32>
    %136 = arith.cmpf ogt, %134, %135 : vector<8x128xf32>
    %cst_73 = arith.constant 0.000000e+00 : f32
    %137 = vector.broadcast %cst_73 : f32 to vector<8x128xf32>
    %138 = arith.select %136, %137, %134 : vector<8x128xi1>, vector<8x128xf32>
    %139 = arith.extui %136 : vector<8x128xi1> to vector<8x128xi32>
    %140 = arith.sitofp %139 : vector<8x128xi32> to vector<8x128xf32>
    %141 = arith.subf %140, %129 : vector<8x128xf32>
    %cst_74 = arith.constant 5.000000e-01 : f32
    %142 = vector.broadcast %cst_74 : f32 to vector<8x128xf32>
    %143 = arith.mulf %141, %142 : vector<8x128xf32>
    %144 = arith.addf %129, %143 : vector<8x128xf32>
    %c32_75 = arith.constant 32 : index
    %c0_76 = arith.constant 0 : index
    %145 = vector.load %arg5[%c32_75, %c0_76] : memref<64x128xf32, #tpu.memory_space<vmem>>, vector<8x128xf32>
    tpu.vector_store %arg5[%c32_75, %c0_76], %144 {strides = array<i32>} : memref<64x128xf32, #tpu.memory_space<vmem>>, vector<8x128xf32>,
    %cst_77 = arith.constant 8.000000e-01 : f32
    %146 = vector.broadcast %cst_77 : f32 to vector<8x128xf32>
    %147 = arith.mulf %138, %146 : vector<8x128xf32>
    %148 = vector.extract_strided_slice %68 {offsets = [40, 0], sizes = [8, 128], strides = [1, 1]} : vector<64x128xf32> to vector<8x128xf32>
    %149 = arith.addf %147, %148 : vector<8x128xf32>
    %cst_78 = arith.constant 2.000000e-01 : f32
    %150 = vector.broadcast %cst_78 : f32 to vector<8x128xf32>
    %151 = arith.cmpf ogt, %149, %150 : vector<8x128xf32>
    %cst_79 = arith.constant 0.000000e+00 : f32
    %152 = vector.broadcast %cst_79 : f32 to vector<8x128xf32>
    %153 = arith.select %151, %152, %149 : vector<8x128xi1>, vector<8x128xf32>
    %154 = arith.extui %151 : vector<8x128xi1> to vector<8x128xi32>
    %155 = arith.sitofp %154 : vector<8x128xi32> to vector<8x128xf32>
    %156 = arith.subf %155, %144 : vector<8x128xf32>
    %cst_80 = arith.constant 5.000000e-01 : f32
    %157 = vector.broadcast %cst_80 : f32 to vector<8x128xf32>
    %158 = arith.mulf %156, %157 : vector<8x128xf32>
    %159 = arith.addf %144, %158 : vector<8x128xf32>
    %c40_81 = arith.constant 40 : index
    %c0_82 = arith.constant 0 : index
    %160 = vector.load %arg5[%c40_81, %c0_82] : memref<64x128xf32, #tpu.memory_space<vmem>>, vector<8x128xf32>
    tpu.vector_store %arg5[%c40_81, %c0_82], %159 {strides = array<i32>} : memref<64x128xf32, #tpu.memory_space<vmem>>, vector<8x128xf32>,
    %cst_83 = arith.constant 8.000000e-01 : f32
    %161 = vector.broadcast %cst_83 : f32 to vector<8x128xf32>
    %162 = arith.mulf %153, %161 : vector<8x128xf32>
    %163 = vector.extract_strided_slice %68 {offsets = [48, 0], sizes = [8, 128], strides = [1, 1]} : vector<64x128xf32> to vector<8x128xf32>
    %164 = arith.addf %162, %163 : vector<8x128xf32>
    %cst_84 = arith.constant 2.000000e-01 : f32
    %165 = vector.broadcast %cst_84 : f32 to vector<8x128xf32>
    %166 = arith.cmpf ogt, %164, %165 : vector<8x128xf32>
    %cst_85 = arith.constant 0.000000e+00 : f32
    %167 = vector.broadcast %cst_85 : f32 to vector<8x128xf32>
    %168 = arith.select %166, %167, %164 : vector<8x128xi1>, vector<8x128xf32>
    %169 = arith.extui %166 : vector<8x128xi1> to vector<8x128xi32>
    %170 = arith.sitofp %169 : vector<8x128xi32> to vector<8x128xf32>
    %171 = arith.subf %170, %159 : vector<8x128xf32>
    %cst_86 = arith.constant 5.000000e-01 : f32
    %172 = vector.broadcast %cst_86 : f32 to vector<8x128xf32>
    %173 = arith.mulf %171, %172 : vector<8x128xf32>
    %174 = arith.addf %159, %173 : vector<8x128xf32>
    %c48_87 = arith.constant 48 : index
    %c0_88 = arith.constant 0 : index
    %175 = vector.load %arg5[%c48_87, %c0_88] : memref<64x128xf32, #tpu.memory_space<vmem>>, vector<8x128xf32>
    tpu.vector_store %arg5[%c48_87, %c0_88], %174 {strides = array<i32>} : memref<64x128xf32, #tpu.memory_space<vmem>>, vector<8x128xf32>,
    %cst_89 = arith.constant 8.000000e-01 : f32
    %176 = vector.broadcast %cst_89 : f32 to vector<8x128xf32>
    %177 = arith.mulf %168, %176 : vector<8x128xf32>
    %178 = vector.extract_strided_slice %68 {offsets = [56, 0], sizes = [8, 128], strides = [1, 1]} : vector<64x128xf32> to vector<8x128xf32>
    %179 = arith.addf %177, %178 : vector<8x128xf32>
    %cst_90 = arith.constant 2.000000e-01 : f32
    %180 = vector.broadcast %cst_90 : f32 to vector<8x128xf32>
    %181 = arith.cmpf ogt, %179, %180 : vector<8x128xf32>
    %182 = arith.extui %181 : vector<8x128xi1> to vector<8x128xi32>
    %183 = arith.sitofp %182 : vector<8x128xi32> to vector<8x128xf32>
    %184 = arith.subf %183, %174 : vector<8x128xf32>
    %cst_91 = arith.constant 5.000000e-01 : f32
    %185 = vector.broadcast %cst_91 : f32 to vector<8x128xf32>
    %186 = arith.mulf %184, %185 : vector<8x128xf32>
    %187 = arith.addf %174, %186 : vector<8x128xf32>
    %c56_92 = arith.constant 56 : index
    %c0_93 = arith.constant 0 : index
    %188 = vector.load %arg5[%c56_92, %c0_93] : memref<64x128xf32, #tpu.memory_space<vmem>>, vector<8x128xf32>
    tpu.vector_store %arg5[%c56_92, %c0_93], %187 {strides = array<i32>} : memref<64x128xf32, #tpu.memory_space<vmem>>, vector<8x128xf32>,
    %c0_94 = arith.constant 0 : index
    %c0_95 = arith.constant 0 : index
    %189 = vector.load %arg5[%c0_94, %c0_95] : memref<64x128xf32, #tpu.memory_space<vmem>>, vector<64x128xf32>
    %190 = arith.truncf %189 : vector<64x128xf32> to vector<64x128xbf16>
    %c0_96 = arith.constant 0 : index
    %c0_97 = arith.constant 0 : index
    %191 = vector.load %arg3[%c0_96, %c0_97] : memref<128x128xbf16, #tpu.memory_space<vmem>>, vector<128x128xbf16>
    %cst_98 = arith.constant dense<0.000000e+00> : vector<64x128xf32>
    %192 = tpu.matmul %190, %191, %cst_98 {dimension_numbers = #tpu.dot_dimension_numbers<[1], [0], [0], [1], [0, 0, 1, 1], [], []>} : vector<64x128xbf16>, vector<128x128xbf16>, vector<64x128xf32> -> vector<64x128xf32>
    %cst_99 = arith.constant 0.000000e+00 : f32
    %193 = vector.broadcast %cst_99 : f32 to vector<8x128xf32>
    %cst_100 = arith.constant 0.000000e+00 : f32
    %194 = vector.broadcast %cst_100 : f32 to vector<8x128xf32>
    %cst_101 = arith.constant 8.000000e-01 : f32
    %195 = vector.broadcast %cst_101 : f32 to vector<8x128xf32>
    %196 = arith.mulf %193, %195 : vector<8x128xf32>
    %197 = vector.extract_strided_slice %192 {offsets = [0, 0], sizes = [8, 128], strides = [1, 1]} : vector<64x128xf32> to vector<8x128xf32>
    %198 = arith.addf %196, %197 : vector<8x128xf32>
    %cst_102 = arith.constant 2.000000e-01 : f32
    %199 = vector.broadcast %cst_102 : f32 to vector<8x128xf32>
    %200 = arith.cmpf ogt, %198, %199 : vector<8x128xf32>
    %cst_103 = arith.constant 0.000000e+00 : f32
    %201 = vector.broadcast %cst_103 : f32 to vector<8x128xf32>
    %202 = arith.select %200, %201, %198 : vector<8x128xi1>, vector<8x128xf32>
    %203 = arith.extui %200 : vector<8x128xi1> to vector<8x128xi32>
    %204 = arith.sitofp %203 : vector<8x128xi32> to vector<8x128xf32>
    %205 = arith.subf %204, %194 : vector<8x128xf32>
    %cst_104 = arith.constant 5.000000e-01 : f32
    %206 = vector.broadcast %cst_104 : f32 to vector<8x128xf32>
    %207 = arith.mulf %205, %206 : vector<8x128xf32>
    %208 = arith.addf %194, %207 : vector<8x128xf32>
    %c0_105 = arith.constant 0 : index
    %209 = memref.load %arg0[%c0_105] : memref<2xf32, #tpu.memory_space<smem>>
    %210 = vector.broadcast %209 : f32 to vector<8x128xf32>
    %211 = arith.mulf %208, %210 : vector<8x128xf32>
    %c1 = arith.constant 1 : index
    %212 = memref.load %arg0[%c1] : memref<2xf32, #tpu.memory_space<smem>>
    %213 = vector.broadcast %212 : f32 to vector<8x128xf32>
    %214 = arith.addf %211, %213 : vector<8x128xf32>
    %c0_106 = arith.constant 0 : index
    %c0_107 = arith.constant 0 : index
    %215 = vector.load %arg4[%c0_106, %c0_107] : memref<64x128xf32, #tpu.memory_space<vmem>>, vector<8x128xf32>
    tpu.vector_store %arg4[%c0_106, %c0_107], %214 {strides = array<i32>} : memref<64x128xf32, #tpu.memory_space<vmem>>, vector<8x128xf32>,
    %cst_108 = arith.constant 8.000000e-01 : f32
    %216 = vector.broadcast %cst_108 : f32 to vector<8x128xf32>
    %217 = arith.mulf %202, %216 : vector<8x128xf32>
    %218 = vector.extract_strided_slice %192 {offsets = [8, 0], sizes = [8, 128], strides = [1, 1]} : vector<64x128xf32> to vector<8x128xf32>
    %219 = arith.addf %217, %218 : vector<8x128xf32>
    %cst_109 = arith.constant 2.000000e-01 : f32
    %220 = vector.broadcast %cst_109 : f32 to vector<8x128xf32>
    %221 = arith.cmpf ogt, %219, %220 : vector<8x128xf32>
    %cst_110 = arith.constant 0.000000e+00 : f32
    %222 = vector.broadcast %cst_110 : f32 to vector<8x128xf32>
    %223 = arith.select %221, %222, %219 : vector<8x128xi1>, vector<8x128xf32>
    %224 = arith.extui %221 : vector<8x128xi1> to vector<8x128xi32>
    %225 = arith.sitofp %224 : vector<8x128xi32> to vector<8x128xf32>
    %226 = arith.subf %225, %208 : vector<8x128xf32>
    %cst_111 = arith.constant 5.000000e-01 : f32
    %227 = vector.broadcast %cst_111 : f32 to vector<8x128xf32>
    %228 = arith.mulf %226, %227 : vector<8x128xf32>
    %229 = arith.addf %208, %228 : vector<8x128xf32>
    %c0_112 = arith.constant 0 : index
    %230 = memref.load %arg0[%c0_112] : memref<2xf32, #tpu.memory_space<smem>>
    %231 = vector.broadcast %230 : f32 to vector<8x128xf32>
    %232 = arith.mulf %229, %231 : vector<8x128xf32>
    %c1_113 = arith.constant 1 : index
    %233 = memref.load %arg0[%c1_113] : memref<2xf32, #tpu.memory_space<smem>>
    %234 = vector.broadcast %233 : f32 to vector<8x128xf32>
    %235 = arith.addf %232, %234 : vector<8x128xf32>
    %c8_114 = arith.constant 8 : index
    %c0_115 = arith.constant 0 : index
    %236 = vector.load %arg4[%c8_114, %c0_115] : memref<64x128xf32, #tpu.memory_space<vmem>>, vector<8x128xf32>
    tpu.vector_store %arg4[%c8_114, %c0_115], %235 {strides = array<i32>} : memref<64x128xf32, #tpu.memory_space<vmem>>, vector<8x128xf32>,
    %cst_116 = arith.constant 8.000000e-01 : f32
    %237 = vector.broadcast %cst_116 : f32 to vector<8x128xf32>
    %238 = arith.mulf %223, %237 : vector<8x128xf32>
    %239 = vector.extract_strided_slice %192 {offsets = [16, 0], sizes = [8, 128], strides = [1, 1]} : vector<64x128xf32> to vector<8x128xf32>
    %240 = arith.addf %238, %239 : vector<8x128xf32>
    %cst_117 = arith.constant 2.000000e-01 : f32
    %241 = vector.broadcast %cst_117 : f32 to vector<8x128xf32>
    %242 = arith.cmpf ogt, %240, %241 : vector<8x128xf32>
    %cst_118 = arith.constant 0.000000e+00 : f32
    %243 = vector.broadcast %cst_118 : f32 to vector<8x128xf32>
    %244 = arith.select %242, %243, %240 : vector<8x128xi1>, vector<8x128xf32>
    %245 = arith.extui %242 : vector<8x128xi1> to vector<8x128xi32>
    %246 = arith.sitofp %245 : vector<8x128xi32> to vector<8x128xf32>
    %247 = arith.subf %246, %229 : vector<8x128xf32>
    %cst_119 = arith.constant 5.000000e-01 : f32
    %248 = vector.broadcast %cst_119 : f32 to vector<8x128xf32>
    %249 = arith.mulf %247, %248 : vector<8x128xf32>
    %250 = arith.addf %229, %249 : vector<8x128xf32>
    %c0_120 = arith.constant 0 : index
    %251 = memref.load %arg0[%c0_120] : memref<2xf32, #tpu.memory_space<smem>>
    %252 = vector.broadcast %251 : f32 to vector<8x128xf32>
    %253 = arith.mulf %250, %252 : vector<8x128xf32>
    %c1_121 = arith.constant 1 : index
    %254 = memref.load %arg0[%c1_121] : memref<2xf32, #tpu.memory_space<smem>>
    %255 = vector.broadcast %254 : f32 to vector<8x128xf32>
    %256 = arith.addf %253, %255 : vector<8x128xf32>
    %c16_122 = arith.constant 16 : index
    %c0_123 = arith.constant 0 : index
    %257 = vector.load %arg4[%c16_122, %c0_123] : memref<64x128xf32, #tpu.memory_space<vmem>>, vector<8x128xf32>
    tpu.vector_store %arg4[%c16_122, %c0_123], %256 {strides = array<i32>} : memref<64x128xf32, #tpu.memory_space<vmem>>, vector<8x128xf32>,
    %cst_124 = arith.constant 8.000000e-01 : f32
    %258 = vector.broadcast %cst_124 : f32 to vector<8x128xf32>
    %259 = arith.mulf %244, %258 : vector<8x128xf32>
    %260 = vector.extract_strided_slice %192 {offsets = [24, 0], sizes = [8, 128], strides = [1, 1]} : vector<64x128xf32> to vector<8x128xf32>
    %261 = arith.addf %259, %260 : vector<8x128xf32>
    %cst_125 = arith.constant 2.000000e-01 : f32
    %262 = vector.broadcast %cst_125 : f32 to vector<8x128xf32>
    %263 = arith.cmpf ogt, %261, %262 : vector<8x128xf32>
    %cst_126 = arith.constant 0.000000e+00 : f32
    %264 = vector.broadcast %cst_126 : f32 to vector<8x128xf32>
    %265 = arith.select %263, %264, %261 : vector<8x128xi1>, vector<8x128xf32>
    %266 = arith.extui %263 : vector<8x128xi1> to vector<8x128xi32>
    %267 = arith.sitofp %266 : vector<8x128xi32> to vector<8x128xf32>
    %268 = arith.subf %267, %250 : vector<8x128xf32>
    %cst_127 = arith.constant 5.000000e-01 : f32
    %269 = vector.broadcast %cst_127 : f32 to vector<8x128xf32>
    %270 = arith.mulf %268, %269 : vector<8x128xf32>
    %271 = arith.addf %250, %270 : vector<8x128xf32>
    %c0_128 = arith.constant 0 : index
    %272 = memref.load %arg0[%c0_128] : memref<2xf32, #tpu.memory_space<smem>>
    %273 = vector.broadcast %272 : f32 to vector<8x128xf32>
    %274 = arith.mulf %271, %273 : vector<8x128xf32>
    %c1_129 = arith.constant 1 : index
    %275 = memref.load %arg0[%c1_129] : memref<2xf32, #tpu.memory_space<smem>>
    %276 = vector.broadcast %275 : f32 to vector<8x128xf32>
    %277 = arith.addf %274, %276 : vector<8x128xf32>
    %c24_130 = arith.constant 24 : index
    %c0_131 = arith.constant 0 : index
    %278 = vector.load %arg4[%c24_130, %c0_131] : memref<64x128xf32, #tpu.memory_space<vmem>>, vector<8x128xf32>
    tpu.vector_store %arg4[%c24_130, %c0_131], %277 {strides = array<i32>} : memref<64x128xf32, #tpu.memory_space<vmem>>, vector<8x128xf32>,
    %cst_132 = arith.constant 8.000000e-01 : f32
    %279 = vector.broadcast %cst_132 : f32 to vector<8x128xf32>
    %280 = arith.mulf %265, %279 : vector<8x128xf32>
    %281 = vector.extract_strided_slice %192 {offsets = [32, 0], sizes = [8, 128], strides = [1, 1]} : vector<64x128xf32> to vector<8x128xf32>
    %282 = arith.addf %280, %281 : vector<8x128xf32>
    %cst_133 = arith.constant 2.000000e-01 : f32
    %283 = vector.broadcast %cst_133 : f32 to vector<8x128xf32>
    %284 = arith.cmpf ogt, %282, %283 : vector<8x128xf32>
    %cst_134 = arith.constant 0.000000e+00 : f32
    %285 = vector.broadcast %cst_134 : f32 to vector<8x128xf32>
    %286 = arith.select %284, %285, %282 : vector<8x128xi1>, vector<8x128xf32>
    %287 = arith.extui %284 : vector<8x128xi1> to vector<8x128xi32>
    %288 = arith.sitofp %287 : vector<8x128xi32> to vector<8x128xf32>
    %289 = arith.subf %288, %271 : vector<8x128xf32>
    %cst_135 = arith.constant 5.000000e-01 : f32
    %290 = vector.broadcast %cst_135 : f32 to vector<8x128xf32>
    %291 = arith.mulf %289, %290 : vector<8x128xf32>
    %292 = arith.addf %271, %291 : vector<8x128xf32>
    %c0_136 = arith.constant 0 : index
    %293 = memref.load %arg0[%c0_136] : memref<2xf32, #tpu.memory_space<smem>>
    %294 = vector.broadcast %293 : f32 to vector<8x128xf32>
    %295 = arith.mulf %292, %294 : vector<8x128xf32>
    %c1_137 = arith.constant 1 : index
    %296 = memref.load %arg0[%c1_137] : memref<2xf32, #tpu.memory_space<smem>>
    %297 = vector.broadcast %296 : f32 to vector<8x128xf32>
    %298 = arith.addf %295, %297 : vector<8x128xf32>
    %c32_138 = arith.constant 32 : index
    %c0_139 = arith.constant 0 : index
    %299 = vector.load %arg4[%c32_138, %c0_139] : memref<64x128xf32, #tpu.memory_space<vmem>>, vector<8x128xf32>
    tpu.vector_store %arg4[%c32_138, %c0_139], %298 {strides = array<i32>} : memref<64x128xf32, #tpu.memory_space<vmem>>, vector<8x128xf32>,
    %cst_140 = arith.constant 8.000000e-01 : f32
    %300 = vector.broadcast %cst_140 : f32 to vector<8x128xf32>
    %301 = arith.mulf %286, %300 : vector<8x128xf32>
    %302 = vector.extract_strided_slice %192 {offsets = [40, 0], sizes = [8, 128], strides = [1, 1]} : vector<64x128xf32> to vector<8x128xf32>
    %303 = arith.addf %301, %302 : vector<8x128xf32>
    %cst_141 = arith.constant 2.000000e-01 : f32
    %304 = vector.broadcast %cst_141 : f32 to vector<8x128xf32>
    %305 = arith.cmpf ogt, %303, %304 : vector<8x128xf32>
    %cst_142 = arith.constant 0.000000e+00 : f32
    %306 = vector.broadcast %cst_142 : f32 to vector<8x128xf32>
    %307 = arith.select %305, %306, %303 : vector<8x128xi1>, vector<8x128xf32>
    %308 = arith.extui %305 : vector<8x128xi1> to vector<8x128xi32>
    %309 = arith.sitofp %308 : vector<8x128xi32> to vector<8x128xf32>
    %310 = arith.subf %309, %292 : vector<8x128xf32>
    %cst_143 = arith.constant 5.000000e-01 : f32
    %311 = vector.broadcast %cst_143 : f32 to vector<8x128xf32>
    %312 = arith.mulf %310, %311 : vector<8x128xf32>
    %313 = arith.addf %292, %312 : vector<8x128xf32>
    %c0_144 = arith.constant 0 : index
    %314 = memref.load %arg0[%c0_144] : memref<2xf32, #tpu.memory_space<smem>>
    %315 = vector.broadcast %314 : f32 to vector<8x128xf32>
    %316 = arith.mulf %313, %315 : vector<8x128xf32>
    %c1_145 = arith.constant 1 : index
    %317 = memref.load %arg0[%c1_145] : memref<2xf32, #tpu.memory_space<smem>>
    %318 = vector.broadcast %317 : f32 to vector<8x128xf32>
    %319 = arith.addf %316, %318 : vector<8x128xf32>
    %c40_146 = arith.constant 40 : index
    %c0_147 = arith.constant 0 : index
    %320 = vector.load %arg4[%c40_146, %c0_147] : memref<64x128xf32, #tpu.memory_space<vmem>>, vector<8x128xf32>
    tpu.vector_store %arg4[%c40_146, %c0_147], %319 {strides = array<i32>} : memref<64x128xf32, #tpu.memory_space<vmem>>, vector<8x128xf32>,
    %cst_148 = arith.constant 8.000000e-01 : f32
    %321 = vector.broadcast %cst_148 : f32 to vector<8x128xf32>
    %322 = arith.mulf %307, %321 : vector<8x128xf32>
    %323 = vector.extract_strided_slice %192 {offsets = [48, 0], sizes = [8, 128], strides = [1, 1]} : vector<64x128xf32> to vector<8x128xf32>
    %324 = arith.addf %322, %323 : vector<8x128xf32>
    %cst_149 = arith.constant 2.000000e-01 : f32
    %325 = vector.broadcast %cst_149 : f32 to vector<8x128xf32>
    %326 = arith.cmpf ogt, %324, %325 : vector<8x128xf32>
    %cst_150 = arith.constant 0.000000e+00 : f32
    %327 = vector.broadcast %cst_150 : f32 to vector<8x128xf32>
    %328 = arith.select %326, %327, %324 : vector<8x128xi1>, vector<8x128xf32>
    %329 = arith.extui %326 : vector<8x128xi1> to vector<8x128xi32>
    %330 = arith.sitofp %329 : vector<8x128xi32> to vector<8x128xf32>
    %331 = arith.subf %330, %313 : vector<8x128xf32>
    %cst_151 = arith.constant 5.000000e-01 : f32
    %332 = vector.broadcast %cst_151 : f32 to vector<8x128xf32>
    %333 = arith.mulf %331, %332 : vector<8x128xf32>
    %334 = arith.addf %313, %333 : vector<8x128xf32>
    %c0_152 = arith.constant 0 : index
    %335 = memref.load %arg0[%c0_152] : memref<2xf32, #tpu.memory_space<smem>>
    %336 = vector.broadcast %335 : f32 to vector<8x128xf32>
    %337 = arith.mulf %334, %336 : vector<8x128xf32>
    %c1_153 = arith.constant 1 : index
    %338 = memref.load %arg0[%c1_153] : memref<2xf32, #tpu.memory_space<smem>>
    %339 = vector.broadcast %338 : f32 to vector<8x128xf32>
    %340 = arith.addf %337, %339 : vector<8x128xf32>
    %c48_154 = arith.constant 48 : index
    %c0_155 = arith.constant 0 : index
    %341 = vector.load %arg4[%c48_154, %c0_155] : memref<64x128xf32, #tpu.memory_space<vmem>>, vector<8x128xf32>
    tpu.vector_store %arg4[%c48_154, %c0_155], %340 {strides = array<i32>} : memref<64x128xf32, #tpu.memory_space<vmem>>, vector<8x128xf32>,
    %cst_156 = arith.constant 8.000000e-01 : f32
    %342 = vector.broadcast %cst_156 : f32 to vector<8x128xf32>
    %343 = arith.mulf %328, %342 : vector<8x128xf32>
    %344 = vector.extract_strided_slice %192 {offsets = [56, 0], sizes = [8, 128], strides = [1, 1]} : vector<64x128xf32> to vector<8x128xf32>
    %345 = arith.addf %343, %344 : vector<8x128xf32>
    %cst_157 = arith.constant 2.000000e-01 : f32
    %346 = vector.broadcast %cst_157 : f32 to vector<8x128xf32>
    %347 = arith.cmpf ogt, %345, %346 : vector<8x128xf32>
    %348 = arith.extui %347 : vector<8x128xi1> to vector<8x128xi32>
    %349 = arith.sitofp %348 : vector<8x128xi32> to vector<8x128xf32>
    %350 = arith.subf %349, %334 : vector<8x128xf32>
    %cst_158 = arith.constant 5.000000e-01 : f32
    %351 = vector.broadcast %cst_158 : f32 to vector<8x128xf32>
    %352 = arith.mulf %350, %351 : vector<8x128xf32>
    %353 = arith.addf %334, %352 : vector<8x128xf32>
    %c0_159 = arith.constant 0 : index
    %354 = memref.load %arg0[%c0_159] : memref<2xf32, #tpu.memory_space<smem>>
    %355 = vector.broadcast %354 : f32 to vector<8x128xf32>
    %356 = arith.mulf %353, %355 : vector<8x128xf32>
    %c1_160 = arith.constant 1 : index
    %357 = memref.load %arg0[%c1_160] : memref<2xf32, #tpu.memory_space<smem>>
    %358 = vector.broadcast %357 : f32 to vector<8x128xf32>
    %359 = arith.addf %356, %358 : vector<8x128xf32>
    %c56_161 = arith.constant 56 : index
    %c0_162 = arith.constant 0 : index
    %360 = vector.load %arg4[%c56_161, %c0_162] : memref<64x128xf32, #tpu.memory_space<vmem>>, vector<8x128xf32>
    tpu.vector_store %arg4[%c56_161, %c0_162], %359 {strides = array<i32>} : memref<64x128xf32, #tpu.memory_space<vmem>>, vector<8x128xf32>,
    return
  }
}

</mosaic_0001>

<bundles_post_ra>
// kernel: tpu_custom_call.1
= control target key start
LH: loop header
LB: loop body
LE: loop exit
PB: predicated region body
PF: predicated region fallthrough
CT: control target
= control target key end

     0   :  { %9 = vsyncpa [#allocation6], 0  ;;  %s1000_s0 = inlined_call_operand.hbm [shape: f32[2], index: 0, kind: input, shape index: {}]   ;;  %s1001_s1 = inlined_call_operand.hbm [shape: f32[64,128], index: 1, kind: input, shape index: {}]   ;;  %s1002_s2 = inlined_call_operand.hbm [shape: bf16[128,128], index: 2, kind: input, shape index: {}]   ;;  %s1003_s3 = inlined_call_operand.hbm [shape: bf16[128,128], index: 3, kind: input, shape index: {}]   ;;  %s1004_s4 = inlined_call_operand.hbm [shape: f32[64,128], index: 4, kind: output, shape index: {}]  }
   0x1   :  { %10 = vsyncpa [#allocation4], 0 }
   0x2   :  { %11 = vsyncpa [#allocation9], 0 }
   0x3   :  { %12 = vsyncpa [#allocation5], 0  ;;  %s857_s15 = smov [#allocation8]   ;;  %s751_s19 = scalar_lea.hbm %s1002_s2, 1024 }
   0x4   :  { %s38_s16 = sshll.u32 %s857_s15, 4  ;;  %p752_p0 = scmp.ne.s32.totalorder %s1002_s2, %s751_s19  ;;  %s39_s16 = int_to_ptr.vmem [resolvable:$true] %s38_s16 }
   0x5   :  { %p755_p1 = scmp.lt.u32.totalorder %s751_s19, %s1002_s2 }
   0x7   :  { %p757_p2 = pnand %p755_p1, %p752_p0 }
   0x9   :  { %760 = shalt.err (!%p757_p2)
}
   0xa   :  { %s761_s24 = scalar_lea.vmem %s39_s16, 1024  ;;  %p766_p4 = scmp.lt.s32.totalorder %s39_s16, %s39_s16 }
   0xb   :  { %p762_p3 = scmp.ne.s32.totalorder %s39_s16, %s761_s24  ;;  %p767_p5 = scmp.lt.s32.totalorder %s761_s24, %s761_s24 }
   0xd   :  { %p768_p6 = por %p767_p5, %p766_p4 }
   0xf   :  { %p769_p7 = pnand %p768_p6, %p762_p3 }
  0x11   :  { %772 = shalt.err (!%p769_p7)
}
  0x12   :  { %s858_s25 = smov 64   ;;  %s859_s26 = smov 4  }
  0x13   :  { %44 = dma.hbm_to_vmem [thread:$0]  %s1002_s2, 1024, %s39_s16, [#allocation9], %s858_s25, %s858_s25, %s859_s26  }
  0x14   :  { %s773_s5 = scalar_lea.hbm %s1000_s0, 16 }
  0x15   :  { %p774_p8 = scmp.ne.s32.totalorder %s1000_s0, %s773_s5  ;;  %p777_p9 = scmp.lt.u32.totalorder %s773_s5, %s1000_s0 }
  0x17   :  { %p779_p10 = pnand %p777_p9, %p774_p8 }
  0x19   :  { %782 = shalt.err (!%p779_p10)
}
  0x1a   :  { %s860_s10 = smov [#allocation3]   ;;  %s861_s2 = smov [#allocation7]  }
  0x1b   :  { %20 = dma.hbm_to_smem %s1000_s0, 16, %s860_s10, [#allocation6]  }
  0x1c   :  { %s26_s13 = sshll.u32 %s861_s2, 4  ;;  %s783_s16 = scalar_lea.hbm %s1001_s1, 1024  ;;  %s27_s13 = int_to_ptr.vmem [resolvable:$true] %s26_s13 }
  0x1d   :  { %p784_p11 = scmp.ne.s32.totalorder %s1001_s1, %s783_s16  ;;  %p787_p12 = scmp.lt.u32.totalorder %s783_s16, %s1001_s1 }
  0x1f   :  { %p789_p13 = pnand %p787_p12, %p784_p11 }
  0x21   :  { %792 = shalt.err (!%p789_p13)
}
  0x22   :  { %s793_s21 = scalar_lea.vmem %s27_s13, 1024  ;;  %p798_p1 = scmp.lt.s32.totalorder %s27_s13, %s27_s13 }
  0x23   :  { %p794_p0 = scmp.ne.s32.totalorder %s27_s13, %s793_s21  ;;  %p799_p2 = scmp.lt.s32.totalorder %s793_s21, %s793_s21 }
  0x25   :  { %p800_p3 = por %p799_p2, %p798_p1 }
  0x27   :  { %p801_p4 = pnand %p800_p3, %p794_p0 }
  0x29   :  { %804 = shalt.err (!%p801_p4)
}
  0x2a   :  { %s862_s0 = smov 128   ;;  %s863_s22 = smov 8  }
  0x2b   :  { %32 = dma.hbm_to_vmem [thread:$0]  %s1001_s1, 1024, %s27_s13, [#allocation4], %s862_s0, %s862_s0, %s863_s22  }
  0x2c   :  { %s864_s27 = smov [#allocation10]   ;;  %s805_s5 = scalar_lea.hbm %s1003_s3, 1024 }
  0x2d   :  { %s50_s28 = sshll.u32 %s864_s27, 4  ;;  %p806_p5 = scmp.ne.s32.totalorder %s1003_s3, %s805_s5  ;;  %s51_s28 = int_to_ptr.vmem [resolvable:$true] %s50_s28 }
  0x2e   :  { %p809_p6 = scmp.lt.u32.totalorder %s805_s5, %s1003_s3 }
  0x30   :  { %p811_p7 = pnand %p809_p6, %p806_p5 }
  0x32   :  { %814 = shalt.err (!%p811_p7)
}
  0x33   :  { %s815_s10 = scalar_lea.vmem %s51_s28, 1024  ;;  %p820_p9 = scmp.lt.s32.totalorder %s51_s28, %s51_s28 }
  0x34   :  { %p816_p8 = scmp.ne.s32.totalorder %s51_s28, %s815_s10  ;;  %p821_p10 = scmp.lt.s32.totalorder %s815_s10, %s815_s10 }
  0x36   :  { %p822_p11 = por %p821_p10, %p820_p9 }
  0x38   :  { %p823_p12 = pnand %p822_p11, %p816_p8 }
  0x3a   :  { %826 = shalt.err (!%p823_p12)
}
  0x3b   :  { %56 = dma.hbm_to_vmem [thread:$0]  %s1003_s3, 1024, %s51_s28, [#allocation9], %s858_s25, %s858_s25, %s859_s26  }
  0x3c   :  { %849 = dma.done.wait [#allocation6], 16  }
  0x3d   :  { %850 = vsyncadd [#allocation6], 4294967280 }
  0x3e   :  { %851 = dma.done.wait [#allocation4], 1024  }
  0x3f   :  { %852 = vsyncadd [#allocation4], 4294966272 }
  0x40   :  { %853 = dma.done.wait [#allocation9], 2048  }
  0x41   :  { %854 = vsyncadd [#allocation9], 4294965248 }
  0x42   :  { %69 = sfence }
  0x43   :  { %v735_v0 = vld [vmem:[#allocation8] sm:$0xff]   ;;  %v736_v1 = vld [vmem:[#allocation8 + $0x8] sm:$0xff]   ;;  %v737_v2 = vld [vmem:[#allocation8 + $0x10] sm:$0xff]   ;;  %v865_v56 = vmov 0.0   ;;  %s476_s3 = sld [smem:[#allocation3]]  ;;  %s638_s25 = sld [smem:[#allocation3 + $0x1]] }
  0x44   :  { %677 = vmatprep.subr.bf16.mxu0 %v735_v0  ;;  %v738_v3 = vld [vmem:[#allocation8 + $0x18] sm:$0xff]   ;;  %v71_v4 = vld [vmem:[#allocation7] sm:$0xff]  ;;  %v76_v7 = vld [vmem:[#allocation7 + $0x8] sm:$0xff]  ;;  %s866_s26 = smov [#allocation11]  }
  0x45   :  { %678 = vmatpush3.bf16.msra.mxu0 %v735_v0  ;;  %v73_v5 = vmul.f32 0.5, %v71_v4  ;;  %v739_v6 = vld [vmem:[#allocation8 + $0x20] sm:$0xff]   ;;  %v740_v11 = vld [vmem:[#allocation8 + $0x28] sm:$0xff]   ;;  %v81_v13 = vld [vmem:[#allocation7 + $0x10] sm:$0xff]  ;;  %s599_s12 = sshll.u32 %s866_s26, 4  ;;  %s600_s12 = int_to_ptr.vmem [resolvable:$true] %s599_s12 }
  0x46   :  { %679 = vmatprep.subr.bf16.mxu0 %v736_v1  ;;  %v743_v9 = vld [vmem:[#allocation10] sm:$0xff]   ;;  %v741_v17 = vld [vmem:[#allocation8 + $0x30] sm:$0xff]   ;;  %v86_v19 = vld [vmem:[#allocation7 + $0x18] sm:$0xff]  ;;  %s827_s2 = scalar_lea.vmem %s600_s12, 1024  ;;  %p832_p0 = scmp.lt.s32.totalorder %s600_s12, %s600_s12 }
  0x47   :  { %v75_v8 = vsub.f32 %v71_v4, %v73_v5  ;;  %701 = vmatprep.subr.bf16.mxu1 %v743_v9  ;;  %v742_v21 = vld [vmem:[#allocation8 + $0x38] sm:$0xff]   ;;  %v91_v24 = vld [vmem:[#allocation7 + $0x20] sm:$0xff]  ;;  %v96_v29 = vld [vmem:[#allocation7 + $0x28] sm:$0xff]  ;;  %p828_p13 = scmp.ne.s32.totalorder %s600_s12, %s827_s2  ;;  %p833_p1 = scmp.lt.s32.totalorder %s827_s2, %s827_s2 }
  0x48   :  { %702 = vmatpush3.bf16.msra.mxu1 %v743_v9  ;;  %v101_v33 = vld [vmem:[#allocation7 + $0x30] sm:$0xff]  ;;  %v106_v38 = vld [vmem:[#allocation7 + $0x38] sm:$0xff]  ;;  %v744_v43 = vld [vmem:[#allocation10 + $0x8] sm:$0xff]  }
  0x49   :  { %680 = vmatpush3.bf16.msra.mxu0 %v736_v1  ;;  %v77_v10 = vadd.f32 %v76_v7, %v75_v8  ;;  %703 = vmatprep.subr.bf16.mxu1 %v744_v43  ;;  %v745_v44 = vld [vmem:[#allocation10 + $0x10] sm:$0xff]   ;;  %v746_v45 = vld [vmem:[#allocation10 + $0x18] sm:$0xff]   ;;  %v747_v46 = vld [vmem:[#allocation10 + $0x20] sm:$0xff]   ;;  %p834_p2 = por %p833_p1, %p832_p0 }
  0x4a   :  { %681 = vmatprep.subr.bf16.mxu0 %v737_v2  ;;  %v748_v47 = vld [vmem:[#allocation10 + $0x28] sm:$0xff]   ;;  %v749_v48 = vld [vmem:[#allocation10 + $0x30] sm:$0xff]   ;;  %v750_v49 = vld [vmem:[#allocation10 + $0x38] sm:$0xff]  }
  0x4b   :  { %v78_v12 = vmul.f32 0.5, %v77_v10  ;;  %p835_p3 = pnand %p834_p2, %p828_p13 }
  0x4c   :  { %704 = vmatpush3.bf16.msra.mxu1 %v744_v43 }
  0x4d   :  { %682 = vmatpush3.bf16.msra.mxu0 %v737_v2  ;;  %v80_v14 = vsub.f32 %v77_v10, %v78_v12  ;;  %v118_v15 = vpack.c.bf16 %v78_v12, %v73_v5  ;;  %705 = vmatprep.subr.bf16.mxu1 %v745_v44 }
  0x4e   :  { %683 = vmatprep.subr.bf16.mxu0 %v738_v3 }
  0x4f   :  { %v82_v16 = vadd.f32 %v81_v13, %v80_v14  ;;  %693 = vmatprep.mubr.bf16.mxu0 %v118_v15 }
  0x50   :  { %706 = vmatpush3.bf16.msra.mxu1 %v745_v44 }
  0x51   :  { %684 = vmatpush3.bf16.msra.mxu0 %v738_v3  ;;  %v83_v18 = vmul.f32 0.5, %v82_v16  ;;  %707 = vmatprep.subr.bf16.mxu1 %v746_v45 }
  0x52   :  { %685 = vmatprep.subr.bf16.mxu0 %v739_v6 }
  0x53   :  { %v85_v20 = vsub.f32 %v82_v16, %v83_v18 }
  0x54   :  { %708 = vmatpush3.bf16.msra.mxu1 %v746_v45 }
  0x55   :  { %686 = vmatpush3.bf16.msra.mxu0 %v739_v6  ;;  %v87_v22 = vadd.f32 %v86_v19, %v85_v20  ;;  %709 = vmatprep.subr.bf16.mxu1 %v747_v46 }
  0x56   :  { %687 = vmatprep.subr.bf16.mxu0 %v740_v11 }
  0x57   :  { %v88_v23 = vmul.f32 0.5, %v87_v22 }
  0x58   :  { %710 = vmatpush3.bf16.msra.mxu1 %v747_v46 }
  0x59   :  { %688 = vmatpush3.bf16.msra.mxu0 %v740_v11  ;;  %v90_v25 = vsub.f32 %v87_v22, %v88_v23  ;;  %v119_v26 = vpack.c.bf16 %v88_v23, %v83_v18  ;;  %711 = vmatprep.subr.bf16.mxu1 %v748_v47 }
  0x5a   :  { %689 = vmatprep.subr.bf16.mxu0 %v741_v17 }
  0x5b   :  { %v92_v27 = vadd.f32 %v91_v24, %v90_v25 }
  0x5c   :  { %712 = vmatpush3.bf16.msra.mxu1 %v748_v47 }
  0x5d   :  { %690 = vmatpush3.bf16.msra.mxu0 %v741_v17  ;;  %v93_v28 = vmul.f32 0.5, %v92_v27  ;;  %713 = vmatprep.subr.bf16.mxu1 %v749_v48 }
  0x5e   :  { %691 = vmatprep.subr.bf16.mxu0 %v742_v21 }
  0x5f   :  { %v95_v30 = vsub.f32 %v92_v27, %v93_v28 }
  0x60   :  { %714 = vmatpush3.bf16.msra.mxu1 %v749_v48 }
  0x61   :  { %692 = vmatpush3.bf16.msra.mxu0 %v742_v21  ;;  %v97_v31 = vadd.f32 %v96_v29, %v95_v30  ;;  %715 = vmatprep.subr.bf16.mxu1 %v750_v49 }
  0x63   :  { %v98_v32 = vmul.f32 0.5, %v97_v31 }
  0x64   :  { %694 = vmatmul.mubr.bf16.vlgmr.msra.gmra.mrb[0].mxu0 %v119_v26  ;;  %716 = vmatpush3.bf16.msra.mxu1 %v750_v49 }
  0x65   :  { %v100_v34 = vsub.f32 %v97_v31, %v98_v32  ;;  %v120_v35 = vpack.c.bf16 %v98_v32, %v93_v28 }
  0x67   :  { %697 = vmatprep.mubr.bf16.mxu0 %v120_v35  ;;  %v102_v36 = vadd.f32 %v101_v33, %v100_v34 }
  0x69   :  { %v103_v37 = vmul.f32 0.5, %v102_v36 }
  0x6b   :  { %v105_v39 = vsub.f32 %v102_v36, %v103_v37 }
  0x6d   :  { %v107_v40 = vadd.f32 %v106_v38, %v105_v39 }
  0x6f   :  { %v108_v41 = vmul.f32 0.5, %v107_v40 }
  0x71   :  { %v121_v42 = vpack.c.bf16 %v108_v41, %v103_v37 }
  0x73   :  { %698 = vmatmul.mubr.bf16.gmra.mrb[4].mxu0 %v121_v42 }
 0x137   :  { %v695_v50 = vpop.f32.mrb[0].mxu0 }
 0x138   :  { %v220_v51 = vpop.f32.mrb[1].mxu0 }
 0x139   :  { %vm252_vm0 = vcmp.gt.f32.partialorder %v220_v51, 0.2  ;;  %v696_v52 = vpop.f32.mrb[2].mxu0 }
 0x13a   :  { %v253_v53 = vsel %vm252_vm0, 0.0, %v220_v51  ;;  %v223_v54 = vpop.f32.mrb[3].mxu0  ;;  %v621_v57 = vsel %vm252_vm0, 1.0, %v865_v56 }
 0x13b   :  { %v259_v55 = vmul.f32 0.8, %v253_v53  ;;  %v256_v59 = vmul.f32 0.5, %v621_v57 }
 0x13d   :  { %v260_v58 = vadd.f32 %v259_v55, %v223_v54  ;;  %v958_v55 = vstv %s476_s3 }
 0x13f   :  { %vm261_vm1 = vcmp.gt.f32.partialorder %v260_v58, 0.2 }
 0x140   :  { %v262_v60 = vsel %vm261_vm1, 0.0, %v260_v58  ;;  %v622_v61 = vsel %vm261_vm1, 1.0, %v865_v56 }
 0x141   :  { %v265_v62 = vsub.f32 %v622_v61, %v256_v59  ;;  %v269_v63 = vmul.f32 0.8, %v262_v60  ;;  %v960_v60 = vstv %s638_s25 }
 0x143   :  { %v266_v0 = vmul.f32 0.5, %v265_v62  ;;  %v270_v1 = vadd.f32 %v695_v50, %v269_v63 }
 0x145   :  { %vm271_vm2 = vcmp.gt.f32.partialorder %v270_v1, 0.2  ;;  %v267_v2 = vadd.f32 %v266_v0, %v256_v59 }
 0x146   :  { %v272_v3 = vsel %vm271_vm2, 0.0, %v270_v1  ;;  %v623_v4 = vsel %vm271_vm2, 1.0, %v865_v56  ;;  %v699_v11 = vpop.f32.mrb[4].mxu0 }
 0x147   :  { %v275_v5 = vsub.f32 %v623_v4, %v267_v2  ;;  %v336_v6 = vpack.c.bf16 %v267_v2, %v256_v59  ;;  %v279_v7 = vmul.f32 0.8, %v272_v3  ;;  %v236_v14 = vpop.f32.mrb[5].mxu0 }
 0x148   :  { %v700_v17 = vpop.f32.mrb[6].mxu0 }
 0x149   :  { %v276_v8 = vmul.f32 0.5, %v275_v5  ;;  %717 = vmatprep.mubr.bf16.mxu1 %v336_v6  ;;  %v280_v9 = vadd.f32 %v696_v52, %v279_v7  ;;  %v239_v20 = vpop.f32.mrb[7].mxu0 }
 0x14b   :  { %v277_v10 = vadd.f32 %v276_v8, %v267_v2  ;;  %vm281_vm3 = vcmp.gt.f32.partialorder %v280_v9, 0.2 }
 0x14c   :  { %v282_v12 = vsel %vm281_vm3, 0.0, %v280_v9  ;;  %v624_v13 = vsel %vm281_vm3, 1.0, %v865_v56 }
 0x14d   :  { %v285_v15 = vsub.f32 %v624_v13, %v277_v10  ;;  %v289_v16 = vmul.f32 0.8, %v282_v12 }
 0x14f   :  { %v286_v18 = vmul.f32 0.5, %v285_v15  ;;  %v290_v19 = vadd.f32 %v289_v16, %v236_v14 }
 0x151   :  { %v287_v21 = vadd.f32 %v286_v18, %v277_v10  ;;  %vm291_vm4 = vcmp.gt.f32.partialorder %v290_v19, 0.2 }
 0x152   :  { %v292_v22 = vsel %vm291_vm4, 0.0, %v290_v19  ;;  %v625_v23 = vsel %vm291_vm4, 1.0, %v865_v56 }
 0x153   :  { %v295_v24 = vsub.f32 %v625_v23, %v287_v21  ;;  %v299_v25 = vmul.f32 0.8, %v292_v22  ;;  %v337_v26 = vpack.c.bf16 %v287_v21, %v277_v10 }
 0x155   :  { %v296_v27 = vmul.f32 0.5, %v295_v24  ;;  %v300_v28 = vadd.f32 %v299_v25, %v239_v20  ;;  %718 = vmatmul.mubr.bf16.vlgmr.msra.gmra.mrb[0].mxu1 %v337_v26 }
 0x157   :  { %v297_v29 = vadd.f32 %v296_v27, %v287_v21  ;;  %vm301_vm5 = vcmp.gt.f32.partialorder %v300_v28, 0.2 }
 0x158   :  { %v302_v30 = vsel %vm301_vm5, 0.0, %v300_v28  ;;  %v626_v31 = vsel %vm301_vm5, 1.0, %v865_v56 }
 0x159   :  { %v305_v32 = vsub.f32 %v626_v31, %v297_v29  ;;  %v309_v33 = vmul.f32 0.8, %v302_v30 }
 0x15b   :  { %v306_v34 = vmul.f32 0.5, %v305_v32  ;;  %v310_v35 = vadd.f32 %v699_v11, %v309_v33 }
 0x15d   :  { %v307_v36 = vadd.f32 %v306_v34, %v297_v29  ;;  %vm311_vm6 = vcmp.gt.f32.partialorder %v310_v35, 0.2 }
 0x15e   :  { %v312_v37 = vsel %vm311_vm6, 0.0, %v310_v35  ;;  %v627_v38 = vsel %vm311_vm6, 1.0, %v865_v56 }
 0x15f   :  { %v315_v39 = vsub.f32 %v627_v38, %v307_v36  ;;  %v319_v40 = vmul.f32 0.8, %v312_v37  ;;  %v338_v41 = vpack.c.bf16 %v307_v36, %v297_v29 }
 0x161   :  { %v316_v42 = vmul.f32 0.5, %v315_v39  ;;  %v320_v43 = vadd.f32 %v700_v17, %v319_v40  ;;  %721 = vmatprep.mubr.bf16.mxu1 %v338_v41 }
 0x163   :  { %vm321_vm7 = vcmp.gt.f32.partialorder %v320_v43, 0.2  ;;  %v317_v44 = vadd.f32 %v316_v42, %v307_v36 }
 0x164   :  { %v628_v45 = vsel %vm321_vm7, 1.0, %v865_v56 }
 0x165   :  { %v324_v46 = vsub.f32 %v628_v45, %v317_v44 }
 0x167   :  { %v325_v47 = vmul.f32 0.5, %v324_v46 }
 0x169   :  { %v326_v48 = vadd.f32 %v325_v47, %v317_v44 }
 0x16b   :  { %v339_v49 = vpack.c.bf16 %v326_v48, %v317_v44 }
 0x16d   :  { %722 = vmatmul.mubr.bf16.gmra.mrb[4].mxu1 %v339_v49 }
 0x228   :  { %v719_v50 = vpop.f32.mrb[0].mxu1 }
 0x229   :  { %v438_v51 = vpop.f32.mrb[1].mxu1 }
 0x22a   :  { %vm470_vm8 = vcmp.gt.f32.partialorder %v438_v51, 0.2  ;;  %v720_v52 = vpop.f32.mrb[2].mxu1 }
 0x22b   :  { %v471_v53 = vsel %vm470_vm8, 0.0, %v438_v51  ;;  %v637_v54 = vsel %vm470_vm8, 1.0, %v865_v56  ;;  %v441_v57 = vpop.f32.mrb[3].mxu1 }
 0x22c   :  { %v474_v58 = vmul.f32 0.5, %v637_v54  ;;  %v483_v59 = vmul.f32 0.8, %v471_v53 }
 0x22e   :  { %v478_v61 = vmul.f32 %v958_v55, %v474_v58  ;;  %v484_v62 = vadd.f32 %v483_v59, %v441_v57 }
 0x230   :  { %v481_v63 = vadd.f32 %v960_v60, %v478_v61  ;;  %vm485_vm9 = vcmp.gt.f32.partialorder %v484_v62, 0.2 }
 0x231   :  { %v486_v0 = vsel %vm485_vm9, 0.0, %v484_v62  ;;  %v639_v1 = vsel %vm485_vm9, 1.0, %v865_v56 }
 0x232   :  { %482 = vst [vmem:[#allocation11] sm:$0xff] %v481_v63  ;;  %v489_v2 = vsub.f32 %v639_v1, %v474_v58  ;;  %v499_v3 = vmul.f32 0.8, %v486_v0 }
 0x234   :  { %v490_v4 = vmul.f32 0.5, %v489_v2  ;;  %v500_v5 = vadd.f32 %v719_v50, %v499_v3 }
 0x236   :  { %v491_v6 = vadd.f32 %v490_v4, %v474_v58  ;;  %vm501_vm10 = vcmp.gt.f32.partialorder %v500_v5, 0.2 }
 0x237   :  { %v502_v7 = vsel %vm501_vm10, 0.0, %v500_v5  ;;  %v641_v8 = vsel %vm501_vm10, 1.0, %v865_v56 }
 0x238   :  { %v494_v9 = vmul.f32 %v491_v6, %v958_v55  ;;  %v505_v10 = vsub.f32 %v641_v8, %v491_v6  ;;  %v515_v11 = vmul.f32 0.8, %v502_v7 }
 0x23a   :  { %v497_v12 = vadd.f32 %v494_v9, %v960_v60  ;;  %v506_v13 = vmul.f32 0.5, %v505_v10  ;;  %v516_v14 = vadd.f32 %v720_v52, %v515_v11 }
 0x23c   :  { %498 = vst [vmem:[#allocation11 + $0x8] sm:$0xff] %v497_v12  ;;  %v507_v15 = vadd.f32 %v506_v13, %v491_v6  ;;  %vm517_vm11 = vcmp.gt.f32.partialorder %v516_v14, 0.2 }
 0x23d   :  { %v518_v16 = vsel %vm517_vm11, 0.0, %v516_v14  ;;  %v643_v17 = vsel %vm517_vm11, 1.0, %v865_v56 }
 0x23e   :  { %v510_v18 = vmul.f32 %v507_v15, %v958_v55  ;;  %v521_v19 = vsub.f32 %v643_v17, %v507_v15  ;;  %v531_v23 = vmul.f32 0.8, %v518_v16 }
 0x240   :  { %v723_v20 = vpop.f32.mrb[4].mxu1  ;;  %v513_v21 = vadd.f32 %v510_v18, %v960_v60  ;;  %v522_v22 = vmul.f32 0.5, %v521_v19 }
 0x241   :  { %v454_v24 = vpop.f32.mrb[5].mxu1 }
 0x242   :  { %514 = vst [vmem:[#allocation11 + $0x10] sm:$0xff] %v513_v21  ;;  %v523_v25 = vadd.f32 %v522_v22, %v507_v15  ;;  %v532_v26 = vadd.f32 %v531_v23, %v454_v24  ;;  %v724_v27 = vpop.f32.mrb[6].mxu1 }
 0x243   :  { %v457_v28 = vpop.f32.mrb[7].mxu1 }
 0x244   :  { %v526_v29 = vmul.f32 %v523_v25, %v958_v55  ;;  %vm533_vm12 = vcmp.gt.f32.partialorder %v532_v26, 0.2 }
 0x245   :  { %v534_v30 = vsel %vm533_vm12, 0.0, %v532_v26  ;;  %v645_v31 = vsel %vm533_vm12, 1.0, %v865_v56 }
 0x246   :  { %v529_v32 = vadd.f32 %v526_v29, %v960_v60  ;;  %v537_v33 = vsub.f32 %v645_v31, %v523_v25  ;;  %v547_v34 = vmul.f32 0.8, %v534_v30 }
 0x248   :  { %530 = vst [vmem:[#allocation11 + $0x18] sm:$0xff] %v529_v32  ;;  %v538_v35 = vmul.f32 0.5, %v537_v33  ;;  %v548_v36 = vadd.f32 %v547_v34, %v457_v28 }
 0x24a   :  { %v539_v37 = vadd.f32 %v538_v35, %v523_v25  ;;  %vm549_vm13 = vcmp.gt.f32.partialorder %v548_v36, 0.2 }
 0x24b   :  { %v550_v38 = vsel %vm549_vm13, 0.0, %v548_v36  ;;  %v647_v39 = vsel %vm549_vm13, 1.0, %v865_v56 }
 0x24c   :  { %v542_v40 = vmul.f32 %v539_v37, %v958_v55  ;;  %v553_v41 = vsub.f32 %v647_v39, %v539_v37  ;;  %v563_v42 = vmul.f32 0.8, %v550_v38 }
 0x24e   :  { %v545_v43 = vadd.f32 %v542_v40, %v960_v60  ;;  %v554_v44 = vmul.f32 0.5, %v553_v41  ;;  %v564_v45 = vadd.f32 %v723_v20, %v563_v42 }
 0x250   :  { %546 = vst [vmem:[#allocation11 + $0x20] sm:$0xff] %v545_v43  ;;  %v555_v46 = vadd.f32 %v554_v44, %v539_v37  ;;  %vm565_vm14 = vcmp.gt.f32.partialorder %v564_v45, 0.2 }
 0x251   :  { %v566_v47 = vsel %vm565_vm14, 0.0, %v564_v45  ;;  %v649_v48 = vsel %vm565_vm14, 1.0, %v865_v56 }
 0x252   :  { %v558_v49 = vmul.f32 %v555_v46, %v958_v55  ;;  %v569_v50 = vsub.f32 %v649_v48, %v555_v46  ;;  %v579_v51 = vmul.f32 0.8, %v566_v47 }
 0x254   :  { %v561_v52 = vadd.f32 %v558_v49, %v960_v60  ;;  %v570_v53 = vmul.f32 0.5, %v569_v50  ;;  %v580_v54 = vadd.f32 %v724_v27, %v579_v51 }
 0x256   :  { %562 = vst [vmem:[#allocation11 + $0x28] sm:$0xff] %v561_v52  ;;  %v571_v57 = vadd.f32 %v570_v53, %v555_v46  ;;  %vm581_vm15 = vcmp.gt.f32.partialorder %v580_v54, 0.2 }
 0x257   :  { %v651_v58 = vsel %vm581_vm15, 1.0, %v865_v56 }
 0x258   :  { %v574_v59 = vmul.f32 %v571_v57, %v958_v55  ;;  %v584_v61 = vsub.f32 %v651_v58, %v571_v57 }
 0x25a   :  { %v577_v62 = vadd.f32 %v574_v59, %v960_v60  ;;  %v585_v63 = vmul.f32 0.5, %v584_v61 }
 0x25c   :  { %578 = vst [vmem:[#allocation11 + $0x30] sm:$0xff] %v577_v62  ;;  %v586_v0 = vadd.f32 %v585_v63, %v571_v57 }
 0x25e   :  { %v589_v1 = vmul.f32 %v586_v0, %v958_v55 }
 0x260   :  { %v592_v2 = vadd.f32 %v589_v1, %v960_v60 }
 0x262   :  { %593 = vst [vmem:[#allocation11 + $0x38] sm:$0xff] %v592_v2 }
 0x263   :  { %838 = shalt.err (!%p835_p3)
}
 0x264   :  { %s839_s15 = scalar_lea.hbm %s1004_s4, 1024 }
 0x265   :  { %p840_p4 = scmp.ne.s32.totalorder %s1004_s4, %s839_s15  ;;  %p843_p5 = scmp.lt.u32.totalorder %s839_s15, %s1004_s4 }
 0x267   :  { %p845_p6 = pnand %p843_p5, %p840_p4 }
 0x269   :  { %848 = shalt.err (!%p845_p6)
}
 0x26a   :  { %605 = dma.vmem_to_hbm [thread:$0]  %s600_s12, 1024, %s1004_s4, [#allocation5], %s862_s0, %s862_s0, %s863_s22  }
 0x26b   :  { %855 = dma.done.wait [#allocation5], 1024  }
 0x26c   :  { %856 = vsyncadd [#allocation5], 4294966272 }
 0x26d   :  { %609 = vsyncpa [#allocation4], 1 }
 0x26e   :  { %610 = vsyncpa [#allocation9], 1 }
 0x26f   :  { %611 = vsyncpa [#allocation5], 1 }
 0x270   :  { %612 = vsyncpa [#allocation6], 1 }

</bundles_post_ra>
